<compile_context>
chip_gen: v5e
topology: v5e:2x2
jax: 0.10.0
libtpu: 0.0.40
codegen_flags: <defaults>
</compile_context>

<pallas_src>
import functools

import numpy as np
import jax
import jax.numpy as jnp
from jax.experimental import pallas as pl
from jax.experimental.pallas import tpu as pltpu


def _pool_window_preproc_kernel(s_ref, x_ref, o_ref, *,
                                n_im_channels, sh, sw, W,
                                window, scale_mul, scale_add):
    """One (n, row-tile) grid step.

    s_ref : (3, sh*W, Wo) f32   [window-sum matrix, fwd one-hot, bwd one-hot]
    x_ref : (1, C, Ho_t, sh*W)  input tile in its ORIGINAL dtype (cast in-kernel)
    o_ref : (1, C, Ho_t, Wo)    output tile
    """
    C = x_ref.shape[1]
    L = sh * W
    K = sh * sw
    n_im = n_im_channels
    prec = jax.lax.Precision.HIGHEST

    # ---- image channels: mean pool + window + scale, all via one MXU matmul per channel ----
    for c in range(n_im):
        xc = x_ref[0, c].astype(jnp.float32)                 # (Ho_t, L) cast on the VMEM tile
        # window SUM via the K-hot membership matrix (exact: products are value * 1.0)
        y = jnp.dot(xc, s_ref[0], preferred_element_type=jnp.float32, precision=prec)
        if window is not None:
            # mean-pool + clamp + (x - mean)/std fused: clamp on the window *sum*
            y = jnp.clip(y, window[0] * K, window[1] * K)
        y = y * scale_mul + scale_add
        o_ref[0, c] = y.astype(o_ref.dtype)

    # ---- mask / label channels: max pool via XLU lane rolls + one-hot compaction matmul ----
    if n_im < C:
        # lane-roll direction probe (robust to either rotate convention)
        lane_ids = jax.lax.broadcasted_iota(jnp.int32, (8, 128), 1)
        probe = pltpu.roll(lane_ids, shift=127, axis=1)       # 127 == -1 (mod 128)
        is_fwd = probe[0:1, 0:1] == 1                         # (1,1) bool
        sel = jnp.where(is_fwd, s_ref[1], s_ref[2])           # (L, Wo) one-hot compaction

        for c in range(n_im, C):
            xc = x_ref[0, c].astype(jnp.float32)              # (Ho_t, L)
            # reduce over the sw in-row neighbours (lane rolls, XLU slot - nearly free)
            red = xc
            for j in range(1, sw):
                red = jnp.maximum(red, pltpu.roll(xc, shift=(L - j) % L, axis=1))
            # reduce over the sh window rows (they sit W lanes apart after the free reshape)
            full = red
            for k in range(1, sh):
                full = jnp.maximum(full, pltpu.roll(red, shift=(L - k * W) % L, axis=1))
            # compact lanes {wo*sw} -> Wo contiguous lanes via an exact one-hot matmul (MXU)
            y = jnp.dot(full, sel, preferred_element_type=jnp.float32, precision=prec)
            o_ref[0, c] = y.astype(o_ref.dtype)


def _choose_row_tile(Ho, per_row_bytes, budget_bytes):
    """Largest Ho tile (divisor of Ho, multiple of 8 or full extent) within the VMEM budget."""
    cap = max(1, budget_bytes // max(per_row_bytes, 1))
    if Ho <= cap:
        return Ho
    best = None
    for d in range(8, Ho, 8):
        if Ho % d == 0 and d <= cap:
            best = d
    if best is not None:
        return best
    for d in range(8, Ho, 8):            # best effort: smallest multiple-of-8 divisor
        if Ho % d == 0:
            return d
    return Ho


@functools.partial(jax.jit, static_argnames=("pooling_stride", "window", "scaling",
                                             "n_im_channels", "is_lb", "out_dtype"))
def class_ensemble_preprocess(xb, *,
                              pooling_stride=(2, 2),
                              window=(-1.0, 1.5),
                              scaling=(2.0, 0.25),
                              n_im_channels=1,
                              is_lb=False,
                              out_dtype=jnp.float32):
    """JAX/Pallas equivalent of torch_preprocessing.forward (config documented above).

    out_dtype can be set to jnp.bfloat16 to halve output write traffic if the consumer
    accepts it (arithmetic stays in f32 in-kernel).
    """
    N, C, H, W = xb.shape
    sh, sw = pooling_stride
    if H % sh or W % sw:
        raise ValueError("spatial dims must be divisible by the pooling stride")
    Ho, Wo = H // sh, W // sw
    L = sh * W
    K = sh * sw

    # Free row-major view (pure metadata under jit, no HBM pass): the sh rows of each
    # pooling window become adjacent along the lane dimension.
    x2 = xb.reshape(N, C, Ho, L)

    # Selection matrices:
    #   s_sum : K-hot window membership  (lane p belongs to output pixel wo)  -> sum pooling
    #   sel_fwd / sel_bwd : one-hot compaction matrices for either roll convention
    p = jnp.arange(L, dtype=jnp.int32)[:, None]
    wo_idx = jnp.arange(Wo, dtype=jnp.int32)[None, :]
    s_sum = ((p % W) // sw == wo_idx).astype(jnp.float32)
    sel_fwd = (p == wo_idx * sw).astype(jnp.float32)
    sel_bwd = (p == (sh - 1) * W + wo_idx * sw + (sw - 1)).astype(jnp.float32)
    S = jnp.stack([s_sum, sel_fwd, sel_bwd])                  # (3, L, Wo) f32

    # Label path (is_lb=True): every channel is max-pooled, no window / scaling
    # (matches `lbb = self.max_pooling(lbb)` in the torch module).
    n_im = 0 if is_lb else min(int(n_im_channels), C)
    win = None if is_lb else window
    std, mean_ = float(scaling[0]), float(scaling[1])

    # VMEM-budgeted row tiling (double-buffered in + out tiles plus the resident S matrices
    # stay well under the 16 MiB scoped default of v5e; also fine for v6e/v7x).
    in_item = jnp.dtype(xb.dtype).itemsize
    out_item = jnp.dtype(out_dtype).itemsize
    per_row_bytes = 2 * C * (L * in_item + Wo * out_item)     # x2 for double buffering
    budget = 12 * 1024 * 1024 - 2 * int(S.size) * 4
    Ho_t = _choose_row_tile(Ho, per_row_bytes, max(budget, 1024))
    n_h = Ho // Ho_t

    kernel = functools.partial(
        _pool_window_preproc_kernel,
        n_im_channels=n_im, sh=sh, sw=sw, W=W,
        window=win,
        scale_mul=1.0 / (K * std),
        scale_add=-(mean_ / std))

    return pl.pallas_call(
        kernel,
        out_shape=jax.ShapeDtypeStruct((N, C, Ho, Wo), out_dtype),
        grid=(N, n_h),
        in_specs=[
            # selection matrices: constant block index -> fetched into VMEM once
            pl.BlockSpec((3, L, Wo), lambda n, t: (0, 0, 0)),
            # input tile in original dtype: all channels x Ho_t pooled rows x full width
            pl.BlockSpec((1, C, Ho_t, L), lambda n, t: (n, 0, t, 0)),
        ],
        out_specs=pl.BlockSpec((1, C, Ho_t, Wo), lambda n, t: (n, 0, t, 0)),
        compiler_params=pltpu.CompilerParams(
            dimension_semantics=("parallel", "parallel")),
    )(S, x2)


# ----------------------------- pure-jnp references -----------------------------

def _reference_image_path(xb, *, pooling_stride, window, scaling, n_im_channels):
    sh, sw = pooling_stride
    N, C, H, W = xb.shape
    xb = xb.astype(jnp.float32)
    imb = xb[:, :n_im_channels]
    maskb = xb[:, n_im_channels:]
    imb = imb.reshape(N, n_im_channels, H // sh, sh, W // sw, sw).mean(axis=(3, 5))
    imb = jnp.clip(imb, window[0], window[1])
    imb = (imb - scaling[1]) / scaling[0]
    maskb = maskb.reshape(N, C - n_im_channels, H // sh, sh, W // sw, sw).max(axis=(3, 5))
    return jnp.concatenate([imb, maskb], axis=1)


def _reference_label_path(lbb, *, pooling_stride):
    sh, sw = pooling_stride
    N, C, H, W = lbb.shape
    return lbb.astype(jnp.float32).reshape(
        N, C, H // sh, sh, W // sw, sw).max(axis=(3, 5))


if __name__ == "__main__":
    key = jax.random.PRNGKey(0)
    k_im, k_mask, k_lb = jax.random.split(key, 3)

    # xb: batch=2, channels=4 (1 image channel + 3 "prediction mask" channels), 16x16
    N, C, H, W = 2, 4, 16, 16
    n_im_channels = 1
    imb = jax.random.normal(k_im, (N, n_im_channels, H, W), dtype=jnp.float32)
    maskb = (jax.random.uniform(k_mask, (N, C - n_im_channels, H, W)) > 0.5
             ).astype(jnp.float32)
    xb = jnp.concatenate([imb, maskb], axis=1)

    # label batch (is_lb=True path): integer-valued float labels, 1 channel
    lbb = jax.random.randint(k_lb, (N, 1, H, W), 0, 3).astype(jnp.float32)

    cfg = dict(pooling_stride=(2, 2), window=(-1.0, 1.5), scaling=(2.0, 0.25),
               n_im_channels=n_im_channels)

    # is_lb=False path (image + masks)
    out_img = jax.block_until_ready(class_ensemble_preprocess(xb, **cfg, is_lb=False))
    ref_img = _reference_image_path(xb, **cfg)
    np.testing.assert_allclose(np.asarray(out_img), np.asarray(ref_img),
                               rtol=1e-5, atol=1e-5)

    # is_lb=True path (labels -> max pooling only)
    out_lb = jax.block_until_ready(class_ensemble_preprocess(lbb, **cfg, is_lb=True))
    ref_lb = _reference_label_path(lbb, pooling_stride=cfg["pooling_stride"])
    np.testing.assert_allclose(np.asarray(out_lb), np.asarray(ref_lb),
                               rtol=1e-5, atol=1e-5)

    print("KERNEL_OK")
</pallas_src>

<mosaic_0001>
module attributes {stable_mosaic.version = 11 : i64} {
  func.func @_pool_window_preproc_kernel(%arg0: i32, %arg1: i32, %arg2: memref<3x32x8xf32, #tpu.memory_space<vmem>>, %arg3: memref<1x4x8x32xf32, #tpu.memory_space<vmem>>, %arg4: memref<1x4x8x8xf32, #tpu.memory_space<vmem>>) attributes {dimension_semantics = [#tpu.dimension_semantics<parallel>, #tpu.dimension_semantics<parallel>], iteration_bounds = array<i64: 2, 1>, scalar_prefetch = 0 : i64, scratch_operands = 0 : i64, tpu.core_type = #tpu.core_type<tc>, window_params = [{pipeline_mode = #tpu.pipeline_mode<synchronous>, transform_indices = @transform_0, window_bounds = array<i64: 3, 32, 8>}, {transform_indices = @transform_1, window_bounds = array<i64: 1, 4, 8, 32>}, {transform_indices = @transform_2, window_bounds = array<i64: 1, 4, 8, 8>}]} {
    %c0 = arith.constant 0 : index
    %c0_0 = arith.constant 0 : index
    %c0_1 = arith.constant 0 : index
    %c0_2 = arith.constant 0 : index
    %0 = vector.load %arg3[%c0, %c0_0, %c0_1, %c0_2] : memref<1x4x8x32xf32, #tpu.memory_space<vmem>>, vector<1x1x8x32xf32>
    %1 = vector.shape_cast %0 : vector<1x1x8x32xf32> to vector<8x32xf32>
    %c0_3 = arith.constant 0 : index
    %c0_4 = arith.constant 0 : index
    %c0_5 = arith.constant 0 : index
    %2 = vector.load %arg2[%c0_3, %c0_4, %c0_5] : memref<3x32x8xf32, #tpu.memory_space<vmem>>, vector<1x32x8xf32>
    %3 = vector.shape_cast %2 : vector<1x32x8xf32> to vector<32x8xf32>
    %cst = arith.constant dense<0.000000e+00> : vector<8x8xf32>
    %4 = tpu.matmul %1, %3, %cst {dimension_numbers = #tpu.dot_dimension_numbers<[1], [0], [0], [1], [0, 0, 1, 1], [], []>, precision = #tpu.contract_precision<fp32>} : vector<8x32xf32>, vector<32x8xf32>, vector<8x8xf32> -> vector<8x8xf32>
    %cst_6 = arith.constant -4.000000e+00 : f32
    %cst_7 = arith.constant 6.000000e+00 : f32
    %5 = vector.broadcast %cst_6 : f32 to vector<8x8xf32>
    %6 = arith.maximumf %5, %4 : vector<8x8xf32>
    %7 = vector.broadcast %cst_7 : f32 to vector<8x8xf32>
    %8 = arith.minimumf %7, %6 : vector<8x8xf32>
    %cst_8 = arith.constant 1.250000e-01 : f32
    %9 = vector.broadcast %cst_8 : f32 to vector<8x8xf32>
    %10 = arith.mulf %8, %9 : vector<8x8xf32>
    %cst_9 = arith.constant -1.250000e-01 : f32
    %11 = vector.broadcast %cst_9 : f32 to vector<8x8xf32>
    %12 = arith.addf %10, %11 : vector<8x8xf32>
    %c0_10 = arith.constant 0 : index
    %c0_11 = arith.constant 0 : index
    %c0_12 = arith.constant 0 : index
    %c0_13 = arith.constant 0 : index
    %13 = vector.load %arg4[%c0_10, %c0_11, %c0_12, %c0_13] : memref<1x4x8x8xf32, #tpu.memory_space<vmem>>, vector<1x1x8x8xf32>
    %14 = vector.shape_cast %13 : vector<1x1x8x8xf32> to vector<8x8xf32>
    %15 = vector.shape_cast %12 : vector<8x8xf32> to vector<1x1x8x8xf32>
    tpu.vector_store %arg4[%c0_10, %c0_11, %c0_12, %c0_13], %15 {strides = array<i32>} : memref<1x4x8x8xf32, #tpu.memory_space<vmem>>, vector<1x1x8x8xf32>,
    %16 = tpu.iota {dimensions = array<i32: 1>} : vector<8x128xi32>
    %c127_i32 = arith.constant 127 : i32
    %17 = tpu.dynamic_rotate %16 by %c127_i32 dim 1 : vector<8x128xi32>, i32 -> vector<8x128xi32>
    %18 = vector.extract_strided_slice %17 {offsets = [0, 0], sizes = [1, 1], strides = [1, 1]} : vector<8x128xi32> to vector<1x1xi32>
    %c1_i32 = arith.constant 1 : i32
    %19 = vector.broadcast %c1_i32 : i32 to vector<1x1xi32>
    %20 = arith.cmpi eq, %18, %19 : vector<1x1xi32>
    %c1 = arith.constant 1 : index
    %c0_14 = arith.constant 0 : index
    %c0_15 = arith.constant 0 : index
    %21 = vector.load %arg2[%c1, %c0_14, %c0_15] : memref<3x32x8xf32, #tpu.memory_space<vmem>>, vector<1x32x8xf32>
    %22 = vector.shape_cast %21 : vector<1x32x8xf32> to vector<32x8xf32>
    %c2 = arith.constant 2 : index
    %c0_16 = arith.constant 0 : index
    %c0_17 = arith.constant 0 : index
    %23 = vector.load %arg2[%c2, %c0_16, %c0_17] : memref<3x32x8xf32, #tpu.memory_space<vmem>>, vector<1x32x8xf32>
    %24 = vector.shape_cast %23 : vector<1x32x8xf32> to vector<32x8xf32>
    %25 = vector.shape_cast %20 : vector<1x1xi1> to vector<1x1xi1>
    %26 = vector.broadcast %25 : vector<1x1xi1> to vector<32x8xi1>
    %27 = arith.select %26, %22, %24 : vector<32x8xi1>, vector<32x8xf32>
    %c0_18 = arith.constant 0 : index
    %c1_19 = arith.constant 1 : index
    %c0_20 = arith.constant 0 : index
    %c0_21 = arith.constant 0 : index
    %28 = vector.load %arg3[%c0_18, %c1_19, %c0_20, %c0_21] : memref<1x4x8x32xf32, #tpu.memory_space<vmem>>, vector<1x1x8x32xf32>
    %29 = vector.shape_cast %28 : vector<1x1x8x32xf32> to vector<8x32xf32>
    %c31_i32 = arith.constant 31 : i32
    %30 = tpu.dynamic_rotate %29 by %c31_i32 dim 1 : vector<8x32xf32>, i32 -> vector<8x32xf32>
    %31 = arith.maximumf %29, %30 : vector<8x32xf32>
    %c16_i32 = arith.constant 16 : i32
    %32 = tpu.dynamic_rotate %31 by %c16_i32 dim 1 : vector<8x32xf32>, i32 -> vector<8x32xf32>
    %33 = arith.maximumf %31, %32 : vector<8x32xf32>
    %cst_22 = arith.constant dense<0.000000e+00> : vector<8x8xf32>
    %34 = tpu.matmul %33, %27, %cst_22 {dimension_numbers = #tpu.dot_dimension_numbers<[1], [0], [0], [1], [0, 0, 1, 1], [], []>, precision = #tpu.contract_precision<fp32>} : vector<8x32xf32>, vector<32x8xf32>, vector<8x8xf32> -> vector<8x8xf32>
    %c0_23 = arith.constant 0 : index
    %c1_24 = arith.constant 1 : index
    %c0_25 = arith.constant 0 : index
    %c0_26 = arith.constant 0 : index
    %35 = vector.load %arg4[%c0_23, %c1_24, %c0_25, %c0_26] : memref<1x4x8x8xf32, #tpu.memory_space<vmem>>, vector<1x1x8x8xf32>
    %36 = vector.shape_cast %35 : vector<1x1x8x8xf32> to vector<8x8xf32>
    %37 = vector.shape_cast %34 : vector<8x8xf32> to vector<1x1x8x8xf32>
    tpu.vector_store %arg4[%c0_23, %c1_24, %c0_25, %c0_26], %37 {strides = array<i32>} : memref<1x4x8x8xf32, #tpu.memory_space<vmem>>, vector<1x1x8x8xf32>,
    %c0_27 = arith.constant 0 : index
    %c2_28 = arith.constant 2 : index
    %c0_29 = arith.constant 0 : index
    %c0_30 = arith.constant 0 : index
    %38 = vector.load %arg3[%c0_27, %c2_28, %c0_29, %c0_30] : memref<1x4x8x32xf32, #tpu.memory_space<vmem>>, vector<1x1x8x32xf32>
    %39 = vector.shape_cast %38 : vector<1x1x8x32xf32> to vector<8x32xf32>
    %c31_i32_31 = arith.constant 31 : i32
    %40 = tpu.dynamic_rotate %39 by %c31_i32_31 dim 1 : vector<8x32xf32>, i32 -> vector<8x32xf32>
    %41 = arith.maximumf %39, %40 : vector<8x32xf32>
    %c16_i32_32 = arith.constant 16 : i32
    %42 = tpu.dynamic_rotate %41 by %c16_i32_32 dim 1 : vector<8x32xf32>, i32 -> vector<8x32xf32>
    %43 = arith.maximumf %41, %42 : vector<8x32xf32>
    %cst_33 = arith.constant dense<0.000000e+00> : vector<8x8xf32>
    %44 = tpu.matmul %43, %27, %cst_33 {dimension_numbers = #tpu.dot_dimension_numbers<[1], [0], [0], [1], [0, 0, 1, 1], [], []>, precision = #tpu.contract_precision<fp32>} : vector<8x32xf32>, vector<32x8xf32>, vector<8x8xf32> -> vector<8x8xf32>
    %c0_34 = arith.constant 0 : index
    %c2_35 = arith.constant 2 : index
    %c0_36 = arith.constant 0 : index
    %c0_37 = arith.constant 0 : index
    %45 = vector.load %arg4[%c0_34, %c2_35, %c0_36, %c0_37] : memref<1x4x8x8xf32, #tpu.memory_space<vmem>>, vector<1x1x8x8xf32>
    %46 = vector.shape_cast %45 : vector<1x1x8x8xf32> to vector<8x8xf32>
    %47 = vector.shape_cast %44 : vector<8x8xf32> to vector<1x1x8x8xf32>
    tpu.vector_store %arg4[%c0_34, %c2_35, %c0_36, %c0_37], %47 {strides = array<i32>} : memref<1x4x8x8xf32, #tpu.memory_space<vmem>>, vector<1x1x8x8xf32>,
    %c0_38 = arith.constant 0 : index
    %c3 = arith.constant 3 : index
    %c0_39 = arith.constant 0 : index
    %c0_40 = arith.constant 0 : index
    %48 = vector.load %arg3[%c0_38, %c3, %c0_39, %c0_40] : memref<1x4x8x32xf32, #tpu.memory_space<vmem>>, vector<1x1x8x32xf32>
    %49 = vector.shape_cast %48 : vector<1x1x8x32xf32> to vector<8x32xf32>
    %c31_i32_41 = arith.constant 31 : i32
    %50 = tpu.dynamic_rotate %49 by %c31_i32_41 dim 1 : vector<8x32xf32>, i32 -> vector<8x32xf32>
    %51 = arith.maximumf %49, %50 : vector<8x32xf32>
    %c16_i32_42 = arith.constant 16 : i32
    %52 = tpu.dynamic_rotate %51 by %c16_i32_42 dim 1 : vector<8x32xf32>, i32 -> vector<8x32xf32>
    %53 = arith.maximumf %51, %52 : vector<8x32xf32>
    %cst_43 = arith.constant dense<0.000000e+00> : vector<8x8xf32>
    %54 = tpu.matmul %53, %27, %cst_43 {dimension_numbers = #tpu.dot_dimension_numbers<[1], [0], [0], [1], [0, 0, 1, 1], [], []>, precision = #tpu.contract_precision<fp32>} : vector<8x32xf32>, vector<32x8xf32>, vector<8x8xf32> -> vector<8x8xf32>
    %c0_44 = arith.constant 0 : index
    %c3_45 = arith.constant 3 : index
    %c0_46 = arith.constant 0 : index
    %c0_47 = arith.constant 0 : index
    %55 = vector.load %arg4[%c0_44, %c3_45, %c0_46, %c0_47] : memref<1x4x8x8xf32, #tpu.memory_space<vmem>>, vector<1x1x8x8xf32>
    %56 = vector.shape_cast %55 : vector<1x1x8x8xf32> to vector<8x8xf32>
    %57 = vector.shape_cast %54 : vector<8x8xf32> to vector<1x1x8x8xf32>
    tpu.vector_store %arg4[%c0_44, %c3_45, %c0_46, %c0_47], %57 {strides = array<i32>} : memref<1x4x8x8xf32, #tpu.memory_space<vmem>>, vector<1x1x8x8xf32>,
    return
  }
  func.func @transform_0(%arg0: i32, %arg1: i32) -> (i32, i32, i32) {
    %c0_i32 = arith.constant 0 : i32
    %c0_i32_0 = arith.constant 0 : i32
    %c0_i32_1 = arith.constant 0 : i32
    %c0_i32_2 = arith.constant 0 : i32
    return %c0_i32, %c0_i32_0, %c0_i32_1 : i32, i32, i32
  }
  func.func @transform_1(%arg0: i32, %arg1: i32) -> (i32, i32, i32, i32) {
    %c0_i32 = arith.constant 0 : i32
    %c0_i32_0 = arith.constant 0 : i32
    %c0_i32_1 = arith.constant 0 : i32
    return %arg0, %c0_i32, %arg1, %c0_i32_0 : i32, i32, i32, i32
  }
  func.func @transform_2(%arg0: i32, %arg1: i32) -> (i32, i32, i32, i32) {
    %c0_i32 = arith.constant 0 : i32
    %c0_i32_0 = arith.constant 0 : i32
    %c0_i32_1 = arith.constant 0 : i32
    return %arg0, %c0_i32, %arg1, %c0_i32_0 : i32, i32, i32, i32
  }
}

</mosaic_0001>

<bundles_post_ra>
// kernel: class_ensemble_preprocess.1
= control target key start
LH: loop header
LB: loop body
LE: loop exit
PB: predicated region body
PF: predicated region fallthrough
CT: control target
= control target key end

     0   :  { %7 = vsyncpa [#allocation3], 0  ;;  %s1665_s0 = inlined_call_operand.vmem [shape: f32[3,32,8], index: 0, kind: input, shape index: {}]   ;;  %s1666_s1 = inlined_call_operand.vmem [shape: f32[2,4,8,32], index: 1, kind: input, shape index: {}]   ;;  %s1667_s2 = inlined_call_operand.hbm [shape: f32[2,4,8,8], index: 2, kind: output, shape index: {}]  }
   0x1   :  { %9 = vsyncpa [#allocation3 + $0x1], 0  ;;  %s1321_s9 = smov 0   ;;  %s1323_s10 = smov 0  }
   0x2   :  { %s1325_s11 = smov 0   ;;  %s1327_s12 = smov 0  }
   0x3   :  { %s1329_s13 = smov 0   ;;  %s1331_s14 = smov 0  }
   0x4 LB: > { %s1128_s15 = sadd.s32 4294967295, %s1298_s14   ;;  %s1129_s16 = sadd.s32 4294967294, %s1298_s14   ;;  %s1298_s14 = sphi %s1331_s14, %s15_s14   ;;  %s1294_s13 = sphi %s1329_s13, %s1674_s13   ;;  %s1290_s12 = sphi %s1327_s12, %s1673_s12   ;;  %s1286_s11 = sphi %s1325_s11, %s1672_s11   ;;  %s1282_s10 = sphi %s1323_s10, %s1671_s10   ;;  %s1278_s9 = sphi %s1321_s9, %s1670_s9  }
   0x5   : > { %s27_s17 = sadd.s32 1, %s1294_s13  ;;  %s85_s18 = sadd.s32 1, %s1286_s11 }
   0x6   : > { %p29_p0 = scmp.ge.s32.totalorder %s27_s17, 2  ;;  %p95_p1 = scmp.ne.s32.totalorder %s1286_s11, %s1282_s10 }
   0x7   : > { %p96_p2 = scmp.eq.s32.totalorder %s1128_s15, 1  ;;  %p101_p3 = scmp.ne.s32.totalorder %s1282_s10, %s1278_s9 }
   0x8   : > { %s1676_s17 = smov (%p29_p0, %s27_s17), 0  ;;  %p102_p5 = scmp.eq.s32.totalorder %s1129_s16, 1 }
   0x9   : > { %p1361_p4 = por %p96_p2, %p95_p1  ;;  %s80_s20 = ssub.s32 %s1294_s13, %s1676_s17 }
   0xa   : > { %p1132_p6 = scmp.ge.s32.totalorder %s1298_s14, 1  ;;  %p83_p7 = scmp.eq.s32.totalorder %s80_s20, 0 }
   0xb   : > { %p1368_p8 = por %p102_p5, %p101_p3  ;;  %p134_p9 = scmp.lt.s32.totalorder %s1298_s14, 3 }
   0xc   : > { %s1374_s22 = scalar_select %p83_p7, %s1286_s11, %s85_s18  }
   0xd   : > { %p135_p10 = pnand %p1132_p6, %p134_p9 }
   0xe   : > { %p159_p11 = scmp.lt.s32.totalorder (!%p135_p10), %s1290_s12, 1  ;;  %s1300_s28 = smov (!%p135_p10), 32  }
   0xf   : > { %138 = sbr.rel (%p135_p10) target bundleno = 909 (0x38d), region = 28  ;;  %s1301_s29 = smov (!%p135_p10), 127  }
  0x10   : > { %s1302_s30 = smov (!%p135_p10), 112   ;;  %s1240_s6 = scalar_lea.hbm (!%p135_p10), %s1667_s2, 64 }
  0x14   : > { %s160_s23 = scalar_select %p159_p11, %s1290_s12, 1  ;;  %vm392_vm0 = vcmask 1047808   ;;  %v367_v15 = vlaneseq  ;;  %v1303_v32 = vmov 0   ;;  %v171_v38 = vld [vmem:[%s1665_s0 + $0x18] sm:$0xff]  ;;  %v1136_v40 = vld [vmem:[%s1665_s0 + $0x20] sm:$0xff]  ;;  %v1137_v41 = vld [vmem:[%s1665_s0 + $0x28] sm:$0xff] }
  0x15   : > { %v1428_v39 = vand.u32 4294901760, %v171_v38  ;;  %v1138_v42 = vld [vmem:[%s1665_s0 + $0x30] sm:$0xff]  ;;  %v1139_v43 = vld [vmem:[%s1665_s0 + $0x38] sm:$0xff]  ;;  %v1140_v44 = vld [vmem:[%s1665_s0 + $0x40] sm:$0xff]  ;;  %vm172_vm2 = vcmask 261120   ;;  %vm365_vm4 = vcmask 64512  }
  0x16   : > { %s1155_s24 = sshll.u32 %s160_s23, 5  ;;  %v368_v16 = vand.u32 127, %v367_v15  ;;  %v1141_v45 = vld [vmem:[%s1665_s0 + $0x48] sm:$0xff]  ;;  %v1142_v47 = vld [vmem:[%s1665_s0 + $0x50] sm:$0xff]  ;;  %v1143_v48 = vld [vmem:[%s1665_s0 + $0x58] sm:$0xff]  ;;  %s1156_s23 = sshll.u32 %s1290_s12, 5 }
  0x17   : > { %s1381_s27 = scalar_lea.vmem %s1666_s1, %s1155_s24  ;;  %189 = vmatpush.msra.mxu0 %v1428_v39  ;;  %v218_v46 = vsub.f32 %v171_v38, %v1428_v39  ;;  %289 = vmatpush.msra.mxu3 %v1428_v39  ;;  %v170_v50 = vld [vmem:[%s1665_s0 + $0x10] sm:$0xff]  ;;  %v169_v52 = vld [vmem:[%s1665_s0 + $0x8] sm:$0xff]  ;;  %v168_v54 = vld [vmem:[%s1665_s0] sm:$0xff]  ;;  %s1046_s26 = scalar_lea.hbm %s1667_s2, %s1156_s23 }
  0x18   : > { %v1144_v0 = vld [vmem:[%s1381_s27 + $0x8] sm:$0xff]  ;;  %v1148_v1 = vld [vmem:[%s1381_s27 + $0x18] sm:$0xff]  ;;  %v1146_v2 = vld [vmem:[%s1381_s27 + $0x10] sm:$0xff]  ;;  %v1460_v51 = vand.u32 4294901760, %v170_v50  ;;  %v1478_v63 = vand.u32 4294901760, %v169_v52 }
  0x19   : > { %393 = vrot.lane.b32.xlu0 %v1144_v0, %s1300_s28  ;;  %821 = vrot.lane.b32.xlu1 %v1148_v1, %s1300_s28  ;;  %v219_v53 = vand.u32 4294901760, %v218_v46 }
  0x1a   : > { %260 = vmatpush.msra.mxu2 %v218_v46  ;;  %191 = vmatpush.msra.mxu0 %v1460_v51 }
  0x1b   : > { %291 = vmatpush.msra.mxu3 %v1460_v51 }
  0x1c   : > { %193 = vmatpush.msra.mxu0 %v1478_v63 }
  0x1d   : > { %293 = vmatpush.msra.mxu3 %v1478_v63 }
  0x21   : > { %607 = vrot.lane.b32.xlu0 %v1146_v2, %s1300_s28 }
  0x8b   : > { %v394_v3 = vpop.permute.xlu0 %393  ;;  %v822_v7 = vpop.permute.xlu1 %821 }
  0x8c   : > { %v395_v4 = vsel %vm392_vm0, %v394_v3, %v1144_v0  ;;  %v823_v8 = vsel %vm392_vm0, %v822_v7, %v1148_v1  ;;  %v167_v3 = vld [vmem:[%s1381_s27] sm:$0xff]  ;;  %s156_s27 = sand.u32 1, %s1282_s10  }
  0x8d   : > { %396 = vrot.lane.b32.xlu1 %v395_v4, %s1300_s28  ;;  %s1133_s18 = sshll.u32 %s156_s27, 5  ;;  %s1034_s12 = scalar_lea.sflag [#allocation3], %s156_s27 }
  0x8e   : > { %s1616_s20 = scalar_lea.vmem [#allocation2], %s1133_s18 }
  0x93   : > { %v608_v5 = vpop.permute.xlu0 %607 }
  0x94   : > { %v609_v6 = vsel %vm392_vm0, %v608_v5, %v1146_v2 }
  0x95   : > { %610 = vrot.lane.b32.xlu2 %v609_v6, %s1300_s28 }
  0x9d   : > { %824 = vrot.lane.b32.xlu2 %v823_v8, %s1300_s28 }
  0xef   : > { %v611_v9 = vpop.permute.xlu2 %610 }
  0xf0   : > { %v612_v10 = vsel %vm392_vm0, %v611_v9, %v1146_v2 }
  0xf1   : > { %614 = vrot.lane.b32.xlu1 %v612_v10, %s1301_s29  ;;  %v230_v10 = vsub.f32 %v169_v52, %v1478_v63 }
  0xf7   : > { %v825_v11 = vpop.permute.xlu2 %824 }
  0xf8   : > { %v826_v12 = vsel %vm392_vm0, %v825_v11, %v1148_v1 }
  0xf9   : > { %828 = vrot.lane.b32.xlu2 %v826_v12, %s1301_s29  ;;  %v174_v12 = vsel %vm172_vm2, %v167_v3, 0 }
  0xff   : > { %v397_v13 = vpop.permute.xlu1 %396 }
 0x100   : > { %v398_v14 = vsel %vm392_vm0, %v397_v13, %v1144_v0 }
 0x101   : > { %400 = vrot.lane.b32.xlu0 %v398_v14, %s1301_s29  ;;  %369 = vrot.lane.b32.xlu2 %v368_v16, %s1301_s29  ;;  %s1049_s29 = sshll.u32 %s1046_s26, 4  ;;  %s1050_s29 = int_to_ptr.hbm [resolvable:$true] %s1049_s29 }
 0x153   : > { %v829_v21 = vpop.permute.xlu2 %828 }
 0x154   : > { %v1406_v22 = vmax.f32 %v1148_v1, %v829_v21  ;;  %v1480_v1 = vand.u32 4294901760, %v168_v54  ;;  %v196_v21 = vand.u32 4294901760, %v174_v12 }
 0x156   : > { %v236_v11 = vsub.f32 %v168_v54, %v1480_v1  ;;  %195 = vmatpush.msra.mxu0 %v1480_v1  ;;  %295 = vmatpush.msra.mxu3 %v1480_v1 }
 0x158   : > { %318 = vmatpush.msrb.mxu0 %v219_v53 }
 0x15b   : > { %v370_v29 = vpop.permute.xlu2 %369 }
 0x15c   : > { %vm371_vm1 = vcmp.eq.s32.totalorder %v370_v29, 1 }
 0x15d   : > { %v382_v33 = vsel %vm371_vm1, 1, %v1303_v32 }
 0x15e   : > { %1157 = vpush %v382_v33 }
 0x163   : > { %v615_v17 = vpop.permute.xlu1 %614 }
 0x164   : > { %v1398_v18 = vmax.f32 %v1146_v2, %v615_v17  ;;  %v224_v2 = vsub.f32 %v170_v50, %v1460_v51  ;;  %v231_v17 = vand.u32 4294901760, %v230_v10 }
 0x166   : > { %618 = vrot.lane.b32.xlu1 %v1398_v18, %s1300_s28  ;;  %v225_v9 = vand.u32 4294901760, %v224_v2  ;;  %263 = vmatpush.msra.mxu2 %v224_v2 }
 0x168   : > { %v226_v16 = vsub.f32 %v224_v2, %v225_v9  ;;  %266 = vmatpush.msra.mxu2 %v230_v10  ;;  %322 = vmatpush.msrb.mxu0 %v225_v9 }
 0x16a   : > { %269 = vmatpush.msra.mxu2 %v236_v11  ;;  %326 = vmatpush.msrb.mxu0 %v231_v17 }
 0x173   : > { %v401_v19 = vpop.permute.xlu0 %400 }
 0x174   : > { %v1402_v20 = vmax.f32 %v1144_v0, %v401_v19  ;;  %v220_v0 = vsub.f32 %v218_v46, %v219_v53  ;;  %v237_v19 = vand.u32 4294901760, %v236_v11 }
 0x176   : > { %404 = vrot.lane.b32.xlu0 %v1402_v20, %s1300_s28  ;;  %v221_v8 = vand.u32 4294901760, %v220_v0  ;;  %v238_v29 = vsub.f32 %v236_v11, %v237_v19  ;;  %330 = vmatpush.msrb.mxu0 %v237_v19 }
 0x178   : > { %222 = vmatpush.msra.mxu1 %v221_v8 }
 0x17e   : > { %832 = vrot.lane.b32.xlu0 %v1406_v22, %s1300_s28 }
 0x1d8   : > { %v619_v23 = vpop.permute.xlu1 %618 }
 0x1d9   : > { %v620_v24 = vsel %vm392_vm0, %v619_v23, %v1398_v18 }
 0x1da   : > { %621 = vrot.lane.b32.xlu2 %v620_v24, %s1300_s28 }
 0x1e8   : > { %v405_v25 = vpop.permute.xlu0 %404 }
 0x1e9   : > { %v406_v26 = vsel %vm392_vm0, %v405_v25, %v1402_v20 }
 0x1ea   : > { %407 = vrot.lane.b32.xlu1 %v406_v26, %s1300_s28 }
 0x1f0   : > { %v833_v27 = vpop.permute.xlu0 %832 }
 0x1f1   : > { %v834_v28 = vsel %vm392_vm0, %v833_v27, %v1406_v22  ;;  %v227_v27 = vand.u32 4294901760, %v226_v16 }
 0x1f2   : > { %835 = vrot.lane.b32.xlu0 %v834_v28, %s1300_s28  ;;  %s1158_s28 = spop %1157  ;;  %v232_v28 = vsub.f32 %v230_v10, %v231_v17 }
 0x1f3   : > { %v384_v49 = vstv %s1158_s28  ;;  %228 = vmatpush.msra.mxu1 %v227_v27  ;;  %s1047_s28 = sshll.u32 %s1616_s20, 4  ;;  %s1048_s28 = int_to_ptr.vmem [resolvable:$true] %s1047_s28 }
 0x1f4   : > { %vm385_vm3 = vcmp.eq.s32.totalorder %v384_v49, 1  ;;  %v233_v33 = vand.u32 4294901760, %v232_v28 }
 0x1f5   : > { %v386_v55 = vsel %vm385_vm3, %v1136_v40, %v1140_v44  ;;  %v387_v56 = vsel %vm385_vm3, %v1137_v41, %v1141_v45  ;;  %v388_v57 = vsel %vm385_vm3, %v1138_v42, %v1142_v47  ;;  %v389_v58 = vsel %vm385_vm3, %v1139_v43, %v1143_v48 }
 0x1f6   : > { %v1468_v59 = vand.u32 4294901760, %v389_v58  ;;  %v1470_v60 = vand.u32 4294901760, %v388_v57  ;;  %v1472_v61 = vand.u32 4294901760, %v387_v56  ;;  %v1474_v62 = vand.u32 4294901760, %v386_v55  ;;  %234 = vmatpush.msra.mxu1 %v233_v33 }
 0x1f8   : > { %v1485_v4 = vsub.f32 %v389_v58, %v1468_v59  ;;  %v1488_v5 = vsub.f32 %v388_v57, %v1470_v60  ;;  %v1491_v6 = vsub.f32 %v387_v56, %v1472_v61  ;;  %v1494_v7 = vsub.f32 %v386_v55, %v1474_v62  ;;  %431 = vmatpush.msrb.mxu2 %v1468_v59 }
 0x1fa   : > { %v1502_v13 = vand.u32 4294901760, %v1485_v4  ;;  %v1505_v14 = vand.u32 4294901760, %v1488_v5  ;;  %v1508_v15 = vand.u32 4294901760, %v1491_v6  ;;  %v1518_v26 = vand.u32 4294901760, %v1494_v7  ;;  %433 = vmatpush.msrb.mxu2 %v1470_v60 }
 0x1fc   : > { %v462_v23 = vsub.f32 %v1485_v4, %v1502_v13  ;;  %v468_v24 = vsub.f32 %v1488_v5, %v1505_v14  ;;  %v474_v25 = vsub.f32 %v1491_v6, %v1508_v15  ;;  %435 = vmatpush.msrb.mxu2 %v1472_v61 }
 0x1fe   : > { %v1523_v32 = vand.u32 4294901760, %v468_v24  ;;  %437 = vmatpush.msrb.mxu2 %v1474_v62 }
 0x234   : > { %v622_v30 = vpop.permute.xlu2 %621 }
 0x235   : > { %v623_v31 = vsel %vm392_vm0, %v622_v30, %v1398_v18  ;;  %v197_v30 = vsub.f32 %v174_v12, %v196_v21 }
 0x236   : > { %625 = vrot.lane.b32.xlu2 %v623_v31, %s1302_s30  ;;  %v1521_v31 = vand.u32 4294901760, %v462_v23 }
 0x237   : > { %272 = vmatmul.f32.vlgmr.msra.gmra.mxu2 %v197_v30 }
 0x238   : > { %464 = vmatpush.msrb.mxu3 %v1521_v31  ;;  %560 = vmatpush.msra.mxu2 %v1502_v13 }
 0x23a   : > { %470 = vmatpush.msrb.mxu3 %v1523_v32  ;;  %564 = vmatpush.msra.mxu2 %v1505_v14 }
 0x23c   : > { %568 = vmatpush.msra.mxu2 %v1508_v15 }
 0x23e   : > { %572 = vmatpush.msra.mxu2 %v1518_v26 }
 0x25c   : > { %v408_v34 = vpop.permute.xlu1 %407 }
 0x25d   : > { %v409_v35 = vsel %vm392_vm0, %v408_v34, %v1402_v20  ;;  %v239_v34 = vand.u32 4294901760, %v238_v29 }
 0x25e   : > { %411 = vrot.lane.b32.xlu1 %v409_v35, %s1302_s30  ;;  %v198_v35 = vand.u32 4294901760, %v197_v30 }
 0x25f   : > { %240 = vmatpush.msra.mxu1 %v239_v34 }
 0x260   : > { %v199_v38 = vsub.f32 %v197_v30, %v198_v35  ;;  %242 = vmatmul.f32.vlgmr.msra.gmra.mxu1 %v196_v21  ;;  %299 = vmatmul.f32.vlgmr.msra.gmra.mxu3 %v198_v35 }
 0x261   : > { %349 = vmatpush.msrb.mxu1 %v1428_v39 }
 0x262   : > { %v200_v40 = vand.u32 4294901760, %v199_v38 }
 0x263   : > { %351 = vmatpush.msrb.mxu1 %v1460_v51 }
 0x264   : > { %v836_v36 = vpop.permute.xlu0 %835  ;;  %201 = vmatmul.f32.vlgmr.msra.gmra.mxu0 %v200_v40 }
 0x265   : > { %v837_v37 = vsel %vm392_vm0, %v836_v36, %v1406_v22  ;;  %v480_v36 = vsub.f32 %v1494_v7, %v1518_v26  ;;  %502 = vmatpush.msra.mxu0 %v1485_v4  ;;  %353 = vmatpush.msrb.mxu1 %v1478_v63 }
 0x266   : > { %839 = vrot.lane.b32.xlu0 %v837_v37, %s1302_s30  ;;  %v1529_v37 = vand.u32 4294901760, %v474_v25  ;;  %s1234_s30 = sshra.s32 %s1050_s29, 4  ;;  %s1235_s30 = int_to_ptr.hbm [resolvable:$true] %s1234_s30 }
 0x267   : > { %v1534_v41 = vand.u32 4294901760, %v480_v36  ;;  %505 = vmatpush.msra.mxu0 %v1488_v5  ;;  %355 = vmatpush.msrb.mxu1 %v1480_v1  ;;  %s1236_s3 = scalar_lea.hbm %s1235_s30, 32  ;;  %p1241_p1 = scmp.lt.s32.totalorder %s1235_s30, %s1667_s2 }
 0x268   : > { %476 = vmatpush.msrb.mxu3 %v1529_v37  ;;  %357 = vmatmul.f32.vlgmr.msrb.gmra.mxu1 %v196_v21  ;;  %p1237_p12 = scmp.ne.s32.totalorder %s1235_s30, %s1236_s3  ;;  %p1242_p2 = scmp.lt.s32.totalorder %s1240_s6, %s1236_s3 }
 0x269   : > { %508 = vmatpush.msra.mxu0 %v1491_v6  ;;  %531 = vmatpush.msra.mxu1 %v1468_v59 }
 0x26a   : > { %482 = vmatpush.msrb.mxu3 %v1534_v41  ;;  %p1238_p13 = pnand %p1237_p12, %p1361_p4  ;;  %p1243_p3 = por %p1242_p2, %p1241_p1 }
 0x26b   : > { %511 = vmatpush.msra.mxu0 %v1494_v7  ;;  %533 = vmatpush.msra.mxu1 %v1470_v60 }
 0x26c   : > { %591 = vmatpush.msra.mxu3 %v1468_v59  ;;  %332 = vmatmul.f32.vlgmr.msrb.gmra.mxu0 %v196_v21  ;;  %p1239_p0 = pneg %p1238_p13 }
 0x26d   : > { %645 = vmatpush.msrb.mxu0 %v1468_v59  ;;  %535 = vmatpush.msra.mxu1 %v1472_v61 }
 0x26e   : > { %593 = vmatpush.msra.mxu3 %v1470_v60  ;;  %p1244_p5 = pnand %p1243_p3, %p1239_p0 }
 0x26f   : > { %647 = vmatpush.msrb.mxu0 %v1470_v60  ;;  %537 = vmatpush.msra.mxu1 %v1474_v62 }
 0x270   : > { %595 = vmatpush.msra.mxu3 %v1472_v61 }
 0x271   : > { %649 = vmatpush.msrb.mxu0 %v1472_v61  ;;  %678 = vmatpush.msrb.mxu1 %v1521_v31 }
 0x272   : > { %597 = vmatpush.msra.mxu3 %v1474_v62 }
 0x273   : > { %651 = vmatpush.msrb.mxu0 %v1474_v62  ;;  %684 = vmatpush.msrb.mxu1 %v1523_v32 }
 0x275   : > { %690 = vmatpush.msrb.mxu1 %v1529_v37 }
 0x277   : > { %696 = vmatpush.msrb.mxu1 %v1534_v41 }
 0x290   : > { %v626_v39 = vpop.permute.xlu2 %625 }
 0x291   : > { %v628_v42 = vmax.f32 %v1398_v18, %v626_v39 }
 0x293   : > { %v630_v43 = vsel %vm172_vm2, %v628_v42, 0 }
 0x294   : > { %v652_v44 = vand.u32 4294901760, %v630_v43 }
 0x296   : > { %v653_v47 = vsub.f32 %v630_v43, %v652_v44 }
 0x298   : > { %v654_v51 = vand.u32 4294901760, %v653_v47 }
 0x2ba   : > { %v273_v1 = vpop.f32.mrf.mxu2 }
 0x2d0   : > { %v412_v45 = vpop.permute.xlu1 %411 }
 0x2d1   : > { %v414_v46 = vmax.f32 %v1402_v20, %v412_v45  ;;  %v655_v20 = vsub.f32 %v653_v47, %v654_v51 }
 0x2d3   : > { %v416_v48 = vsel %vm172_vm2, %v414_v46, 0  ;;  %v656_v55 = vand.u32 4294901760, %v655_v20 }
 0x2d4   : > { %v438_v49 = vand.u32 4294901760, %v416_v48 }
 0x2d6   : > { %v439_v50 = vsub.f32 %v416_v48, %v438_v49  ;;  %484 = vmatmul.f32.vlgmr.msrb.gmra.mxu3 %v438_v49 }
 0x2d7   : > { %745 = vmatpush.msrb.mxu3 %v1468_v59 }
 0x2d8   : > { %514 = vmatmul.f32.vlgmr.msra.gmra.mxu0 %v439_v50  ;;  %v440_v52 = vand.u32 4294901760, %v439_v50  ;;  %v840_v54 = vpop.permute.xlu0 %839 }
 0x2d9   : > { %747 = vmatpush.msrb.mxu3 %v1470_v60  ;;  %774 = vmatpush.msra.mxu0 %v1502_v13  ;;  %v842_v56 = vmax.f32 %v1406_v22, %v840_v54 }
 0x2da   : > { %541 = vmatmul.f32.vlgmr.msra.gmra.mxu1 %v440_v52  ;;  %v441_v18 = vsub.f32 %v439_v50, %v440_v52 }
 0x2db   : > { %749 = vmatpush.msrb.mxu3 %v1472_v61  ;;  %778 = vmatpush.msra.mxu0 %v1505_v14  ;;  %v844_v57 = vsel %vm172_vm2, %v842_v56, 0 }
 0x2dc   : > { %805 = vmatpush.msra.mxu1 %v1468_v59  ;;  %v442_v53 = vand.u32 4294901760, %v441_v18  ;;  %v866_v22 = vand.u32 4294901760, %v844_v57 }
 0x2dd   : > { %751 = vmatpush.msrb.mxu3 %v1474_v62  ;;  %782 = vmatpush.msra.mxu0 %v1508_v15 }
 0x2de   : > { %807 = vmatpush.msra.mxu1 %v1470_v60  ;;  %443 = vmatmul.f32.vlgmr.msrb.gmra.mxu2 %v442_v53  ;;  %v867_v58 = vsub.f32 %v844_v57, %v866_v22 }
 0x2df   : > { %599 = vmatmul.f32.vlgmr.msra.gmra.mxu3 %v438_v49  ;;  %716 = vmatpush.msrb.mxu2 %v1485_v4 }
 0x2e0   : > { %786 = vmatpush.msra.mxu0 %v1518_v26  ;;  %809 = vmatpush.msra.mxu1 %v1472_v61  ;;  %v868_v63 = vand.u32 4294901760, %v867_v58 }
 0x2e1   : > { %892 = vmatpush.msra.mxu3 %v1521_v31  ;;  %657 = vmatmul.f32.vlgmr.msrb.gmra.mxu0 %v656_v55 }
 0x2e2   : > { %719 = vmatpush.msrb.mxu2 %v1488_v5  ;;  %811 = vmatpush.msra.mxu1 %v1474_v62 }
 0x2e3   : > { %898 = vmatpush.msra.mxu3 %v1523_v32  ;;  %930 = vmatpush.msrb.mxu0 %v1485_v4  ;;  %v300_v3 = vpop.f32.mrf.mxu3 }
 0x2e4   : > { %698 = vmatmul.f32.vlgmr.msrb.gmra.mxu1 %v652_v44  ;;  %722 = vmatpush.msrb.mxu2 %v1491_v6 }
 0x2e5   : > { %904 = vmatpush.msra.mxu3 %v1529_v37  ;;  %933 = vmatpush.msrb.mxu0 %v1488_v5 }
 0x2e6   : > { %959 = vmatpush.msrb.mxu1 %v1468_v59  ;;  %725 = vmatpush.msrb.mxu2 %v1494_v7 }
 0x2e7   : > { %910 = vmatpush.msra.mxu3 %v1534_v41  ;;  %936 = vmatpush.msrb.mxu0 %v1491_v6 }
 0x2e8   : > { %961 = vmatpush.msrb.mxu1 %v1470_v60  ;;  %574 = vmatmul.f32.vlgmr.msra.gmra.mxu2 %v438_v49 }
 0x2e9   : > { %755 = vmatmul.f32.vlgmr.msrb.gmra.mxu3 %v654_v51  ;;  %859 = vmatpush.msra.mxu2 %v1468_v59 }
 0x2ea   : > { %939 = vmatpush.msrb.mxu0 %v1494_v7  ;;  %963 = vmatpush.msrb.mxu1 %v1472_v61 }
 0x2eb   : > { %1019 = vmatpush.msrb.mxu3 %v1468_v59  ;;  %788 = vmatmul.f32.vlgmr.msra.gmra.mxu0 %v652_v44  ;;  %v869_v59 = vsub.f32 %v867_v58, %v868_v63 }
 0x2ec   : > { %861 = vmatpush.msra.mxu2 %v1470_v60  ;;  %965 = vmatpush.msrb.mxu1 %v1474_v62 }
 0x2ed   : > { %1021 = vmatpush.msrb.mxu3 %v1470_v60  ;;  %813 = vmatmul.f32.vlgmr.msra.gmra.mxu1 %v652_v44  ;;  %v870_v60 = vand.u32 4294901760, %v869_v59 }
 0x2ee   : > { %863 = vmatpush.msra.mxu2 %v1472_v61 }
 0x2ef   : > { %1023 = vmatpush.msrb.mxu3 %v1472_v61  ;;  %v202_v61 = vpop.f32.mrf.mxu0 }
 0x2f0   : > { %865 = vmatpush.msra.mxu2 %v1474_v62 }
 0x2f1   : > { %1025 = vmatpush.msrb.mxu3 %v1474_v62  ;;  %728 = vmatmul.f32.vlgmr.msrb.gmra.mxu2 %v653_v47  ;;  %v243_v62 = vpop.f32.mrf.mxu1 }
 0x2f2   : > { %912 = vmatmul.f32.vlgmr.msra.gmra.mxu3 %v866_v22  ;;  %988 = vmatpush.msrb.mxu2 %v1502_v13  ;;  %v244_v0 = vadd.f32 %v243_v62, %v202_v61 }
 0x2f3   : > { %942 = vmatmul.f32.vlgmr.msrb.gmra.mxu0 %v867_v58 }
 0x2f4   : > { %992 = vmatpush.msrb.mxu2 %v1505_v14  ;;  %v274_v2 = vadd.f32 %v273_v1, %v244_v0 }
 0x2f5   : > { %969 = vmatmul.f32.vlgmr.msrb.gmra.mxu1 %v868_v63 }
 0x2f6   : > { %996 = vmatpush.msrb.mxu2 %v1508_v15  ;;  %v301_v4 = vadd.f32 %v300_v3, %v274_v2 }
 0x2f7   : > { %v333_v5 = vpop.f32.mrf.mxu0 }
 0x2f8   : > { %1000 = vmatpush.msrb.mxu2 %v1518_v26  ;;  %v334_v6 = vadd.f32 %v333_v5, %v301_v4 }
 0x2f9   : > { %871 = vmatmul.f32.vlgmr.msra.gmra.mxu2 %v870_v60  ;;  %v358_v7 = vpop.f32.mrf.mxu1 }
 0x2fa   : > { %1027 = vmatmul.f32.vlgmr.msrb.gmra.mxu3 %v866_v22  ;;  %v359_v8 = vadd.f32 %v358_v7, %v334_v6 }
 0x2fc   : > { %v361_v9 = vmax.f32 %v359_v8, -4.0 }
 0x2fe   : > { %v362_v10 = vmin.f32 %v361_v9, 6.0 }
 0x300   : > { %v363_v11 = vmul.f32 0.125, %v362_v10 }
 0x301   : > { %1002 = vmatmul.f32.vlgmr.msrb.gmra.mxu2 %v866_v22 }
 0x302   : > { %v364_v12 = vadd.f32 -0.125, %v363_v11 }
 0x304   : > { %366 = vst.msk [vmem:[%s1616_s20] sm:$0xff] %vm365_vm4, %v364_v12 }
 0x355   : > { %v515_v14 = vpop.f32.mrf.mxu0 }
 0x357   : > { %v542_v17 = vpop.f32.mrf.mxu1 }
 0x359   : > { %v485_v13 = vpop.f32.mrf.mxu3 }
 0x35e   : > { %v658_v23 = vpop.f32.mrf.mxu0 }
 0x361   : > { %v444_v15 = vpop.f32.mrf.mxu2  ;;  %v699_v27 = vpop.f32.mrf.mxu1 }
 0x362   : > { %v486_v16 = vadd.f32 %v485_v13, %v444_v15  ;;  %v600_v21 = vpop.f32.mrf.mxu3  ;;  %v700_v30 = vadd.f32 %v699_v27, %v658_v23 }
 0x364   : > { %v516_v19 = vadd.f32 %v515_v14, %v486_v16 }
 0x366   : > { %v543_v24 = vadd.f32 %v542_v17, %v516_v19 }
 0x368   : > { %v789_v31 = vpop.f32.mrf.mxu0 }
 0x36a   : > { %v814_v35 = vpop.f32.mrf.mxu1 }
 0x36b   : > { %v575_v25 = vpop.f32.mrf.mxu2 }
 0x36c   : > { %v576_v26 = vadd.f32 %v575_v25, %v543_v24  ;;  %v756_v29 = vpop.f32.mrf.mxu3 }
 0x36e   : > { %v601_v28 = vadd.f32 %v600_v21, %v576_v26 }
 0x370   : > { %1145 = vst.msk [vmem:[%s1616_s20 + $0x8] sm:$0xff] %vm365_vm4, %v601_v28  ;;  %v943_v39 = vpop.f32.mrf.mxu0 }
 0x372   : > { %v970_v43 = vpop.f32.mrf.mxu1 }
 0x374   : > { %v729_v32 = vpop.f32.mrf.mxu2 }
 0x375   : > { %v730_v33 = vadd.f32 %v729_v32, %v700_v30  ;;  %v913_v38 = vpop.f32.mrf.mxu3 }
 0x377   : > { %v757_v34 = vadd.f32 %v756_v29, %v730_v33 }
 0x379   : > { %v790_v36 = vadd.f32 %v789_v31, %v757_v34 }
 0x37b   : > { %v815_v37 = vadd.f32 %v814_v35, %v790_v36 }
 0x37c   : > { %v872_v40 = vpop.f32.mrf.mxu2 }
 0x37d   : > { %1147 = vst.msk [vmem:[%s1616_s20 + $0x10] sm:$0xff] %vm365_vm4, %v815_v37  ;;  %v914_v41 = vadd.f32 %v913_v38, %v872_v40  ;;  %v1028_v47 = vpop.f32.mrf.mxu3 }
 0x37f   : > { %v944_v42 = vadd.f32 %v943_v39, %v914_v41 }
 0x381   : > { %v971_v44 = vadd.f32 %v970_v43, %v944_v42 }
 0x384   : > { %v1003_v45 = vpop.f32.mrf.mxu2 }
 0x385   : > { %v1004_v46 = vadd.f32 %v1003_v45, %v971_v44 }
 0x387   : > { %v1029_v48 = vadd.f32 %v1028_v47, %v1004_v46 }
 0x389   : > { %1149 = vst.msk [vmem:[%s1616_s20 + $0x18] sm:$0xff] %vm365_vm4, %v1029_v48 }
 0x38a   : > { %1247 = shalt.err (!%p1244_p5)
}
 0x38b   : > { %s1304_s15 = smov 128   ;;  %s1305_s16 = smov 8  }
 0x38c   : > { %1159 = dma.vmem_to_hbm [thread:$0]  (%p1361_p4), %s1048_s28, 512, %s1050_s29, %s1034_s12, %s1304_s15, %s1304_s15, %s1305_s16  }
 0x38d PF: > { %p1165_p6 = scmp.ge.s32.totalorder %s1298_s14, 2  ;;  %s1064_s27 = sand.u32 1, %s1278_s9  }
 0x38e   : > { %s1065_s18 = scalar_lea.sflag [#allocation3], %s1064_s27 }
 0x38f   : > { %p1162_p7 = pnand %p1165_p6, %p1368_p8 }
 0x391   : > { %p1163_p9 = pneg %p1162_p7 }
 0x393   : > { %1273 = dma.done.wait (%p1163_p9), %s1065_s18, 512  }
 0x394   : > { %1275 = vsyncadd (%p1163_p9), %s1065_s18, 4294966784  ;;  %s15_s14 = sadd.s32 1, %s1298_s14   ;;  %s1670_s9 = smov %s1282_s10 }
 0x395   : > { %p12_p10 = scmp.ge.s32.totalorder %s15_s14, 4   ;;  %s1671_s10 = smov %s1286_s11 }
 0x396   : > { %s1672_s11 = smov %s1374_s22  ;;  %s1673_s12 = smov %s1294_s13 }
 0x397   : > { %s1674_s13 = smov %s1676_s17  ;;  %14 = sbr.rel (!%p12_p10) target bundleno = 4 (0x4), region = 71 }
 0x39c   :  { %1071 = vsyncpa [#allocation3], 1 }
 0x39d   :  { %1073 = vsyncpa [#allocation3 + $0x1], 1 }

</bundles_post_ra>
